<compile_context>
chip_gen: v7x
topology: tpu7x:2x2x1
jax: 0.10.0
libtpu: 0.0.40
codegen_flags: <defaults>
</compile_context>

<pallas_src>
import numpy as np
import jax
import jax.numpy as jnp
from jax.experimental import pallas as pl
from jax.experimental.pallas import tpu as pltpu


def _round_up(a: int, b: int) -> int:
    return (a + b - 1) // b * b


def make_ldam_kernel(s: float, n_valid: int, tile_n: int, c_pad: int):
    """Kernel computing one batch-tile's partial sum of LDAM cross-entropy."""

    def kernel(x_ref, tgt_ref, m_ref, loss_ref):
        # Upcast inside the kernel so bf16 logits only cost bf16 HBM traffic.
        x = x_ref[...].astype(jnp.float32)          # (tile_n, c_pad)
        tgt = tgt_ref[...]                          # (tile_n, 1) int32
        m = m_ref[...].astype(jnp.float32)          # (1, c_pad)

        # one-hot (equivalent of index.scatter_(1, target, 1))
        col = jax.lax.broadcasted_iota(jnp.int32, (tile_n, c_pad), 1)
        onehot = col == tgt                         # (tile_n, c_pad) bool

        # batch_m[i] = m_list[target[i]]
        batch_m = jnp.sum(jnp.where(onehot, m, 0.0), axis=1, keepdims=True)

        # subtract margin only on the target logit, then scale
        z = s * jnp.where(onehot, x - batch_m, x)   # (tile_n, c_pad)

        # cross entropy via a numerically stable log-sum-exp
        zmax = jnp.max(z, axis=1, keepdims=True)
        sumexp = jnp.sum(jnp.exp(z - zmax), axis=1, keepdims=True)
        lse = zmax + jnp.log(sumexp)
        z_t = jnp.sum(jnp.where(onehot, z, 0.0), axis=1, keepdims=True)
        per_sample = lse - z_t                      # (tile_n, 1)

        # mask rows that are batch padding (N not a multiple of tile_n)
        row = jax.lax.broadcasted_iota(jnp.int32, (tile_n, 1), 0)
        global_row = pl.program_id(0) * tile_n + row
        per_sample = jnp.where(global_row < n_valid, per_sample, 0.0)

        # tile partial sum, written into a lane-dense (8,128) block (element
        # [0,0,0] carries the value, rest are zeros) -> unmasked full-width vst.
        psum = jnp.sum(per_sample)
        sub = jax.lax.broadcasted_iota(jnp.int32, (1, 8, 128), 1)
        lan = jax.lax.broadcasted_iota(jnp.int32, (1, 8, 128), 2)
        loss_ref[...] = jnp.where((sub == 0) & (lan == 0), psum, 0.0)

    return kernel


def ldam_loss(x, target, m_list, s=30.0, tile_n=None):
    """Pallas LDAM loss.

    x: [N, C] float32 or bfloat16 logits, target: [N] int, m_list: [C] float.
    Returns a float32 scalar (mean LDAM cross-entropy).
    """
    n, c = x.shape
    c_pad = _round_up(c, 128)

    # Tile the batch dim: keep tiles multiple-of-8, large enough to amortize
    # per-step grid overhead, and inside a per-block VMEM budget sized so the
    # double-buffered pipeline fits v7x's 64 MiB VMEM with headroom.
    block_budget_bytes = 8 * 1024 * 1024
    max_rows = max(8, (block_budget_bytes // (c_pad * 4)) // 8 * 8)
    if tile_n is None:
        tile_n = min(512, max_rows, _round_up(n, 8))
    n_pad = _round_up(n, tile_n)
    num_tiles = n_pad // tile_n

    # Pad: logits with a large negative constant (exp -> 0, LSE unchanged),
    # targets with class 0 (rows masked in-kernel), m_list with 0.
    if n_pad > n or c_pad > c:
        x_p = jnp.pad(x, ((0, n_pad - n), (0, c_pad - c)),
                      constant_values=-1e30)
    else:
        x_p = x
    tgt_p = jnp.pad(target.astype(jnp.int32), (0, n_pad - n),
                    constant_values=0).reshape(n_pad, 1)
    m_p = jnp.pad(m_list.astype(jnp.float32), (0, c_pad - c)).reshape(1, c_pad)

    itemsize = jnp.dtype(x.dtype).itemsize
    x_block_bytes = tile_n * c_pad * itemsize
    f32_block_bytes = tile_n * c_pad * 4
    vmem_limit = int(min(32 * 1024 * 1024,
                         max(4 * 1024 * 1024,
                             2 * x_block_bytes + 4 * f32_block_bytes)))

    cost = pl.CostEstimate(
        flops=10 * n_pad * c_pad,
        transcendentals=n_pad * c_pad + n_pad,
        bytes_accessed=(n_pad * c_pad * itemsize      # logits
                        + n_pad * 4                   # targets
                        + c_pad * 4                   # m_list
                        + num_tiles * 8 * 128 * 4),   # partial sums
    )

    partial = pl.pallas_call(
        make_ldam_kernel(float(s), n, tile_n, c_pad),
        out_shape=jax.ShapeDtypeStruct((num_tiles, 8, 128), jnp.float32),
        grid=(num_tiles,),
        in_specs=[
            pl.BlockSpec((tile_n, c_pad), lambda i: (i, 0)),   # logits tile
            pl.BlockSpec((tile_n, 1), lambda i: (i, 0)),       # target tile
            pl.BlockSpec((1, c_pad), lambda i: (0, 0)),        # m_list (shared)
        ],
        out_specs=pl.BlockSpec((1, 8, 128), lambda i: (i, 0, 0)),
        compiler_params=pltpu.CompilerParams(
            dimension_semantics=("parallel",),
            vmem_limit_bytes=vmem_limit,
        ),
        cost_estimate=cost,
    )(x_p, tgt_p, m_p)

    return jnp.sum(partial) / n


def ldam_loss_ref(x, target, m_list, s=30.0):
    """Pure-JAX reference for correctness checking."""
    n, c = x.shape
    onehot = jax.nn.one_hot(target, c, dtype=jnp.float32)
    batch_m = (m_list[None, :] @ onehot.T).reshape(-1, 1)
    x_m = x - batch_m
    out = jnp.where(onehot > 0, x_m, x)
    z = s * out
    logp = jax.nn.log_softmax(z, axis=1)
    nll = -jnp.sum(logp * onehot, axis=1)
    return jnp.mean(nll)


if __name__ == "__main__":
    # Module parameter setup (deterministic, from __init__ semantics).
    num_classes = 20      # not a multiple of 128 -> exercises class padding
    batch = 10            # not a multiple of 8   -> exercises row masking
    max_m = 0.5
    s = 30.0

    cls_num_list = np.arange(1, num_classes + 1, dtype=np.float64) * 10.0
    m_list_np = 1.0 / np.sqrt(np.sqrt(cls_num_list))
    m_list_np = m_list_np * (max_m / np.max(m_list_np))
    m_list = jnp.asarray(m_list_np, dtype=jnp.float32)

    key = jax.random.PRNGKey(0)
    kx, kt = jax.random.split(key)
    x = jax.random.normal(kx, (batch, num_classes), dtype=jnp.float32)
    target = jax.random.randint(kt, (batch,), 0, num_classes, dtype=jnp.int32)

    loss = ldam_loss(x, target, m_list, s=s)
    loss = jax.block_until_ready(loss)

    ref = ldam_loss_ref(x, target, m_list, s=s)
    ref = jax.block_until_ready(ref)

    assert np.allclose(np.asarray(loss), np.asarray(ref), rtol=1e-5, atol=1e-5), (
        f"mismatch: pallas={loss} ref={ref}"
    )
    print("KERNEL_OK")
</pallas_src>

<mosaic_0001>
module attributes {stable_mosaic.version = 11 : i64} {
  func.func @kernel(%arg0: i32, %arg1: memref<16x128xf32, #tpu.memory_space<vmem>>, %arg2: memref<16x1xi32, #tpu.memory_space<vmem>>, %arg3: memref<1x128xf32, #tpu.memory_space<vmem>>, %arg4: memref<1x8x128xf32, #tpu.memory_space<vmem>>) attributes {dimension_semantics = [#tpu.dimension_semantics<parallel>], iteration_bounds = array<i64: 1>, scalar_prefetch = 0 : i64, scratch_operands = 0 : i64, tpu.core_type = #tpu.core_type<tc>, window_params = [{transform_indices = @transform_0, window_bounds = array<i64: 16, 128>}, {transform_indices = @transform_1, window_bounds = array<i64: 16, 1>}, {pipeline_mode = #tpu.pipeline_mode<synchronous>, transform_indices = @transform_2, window_bounds = array<i64: 1, 128>}, {transform_indices = @transform_3, window_bounds = array<i64: 1, 8, 128>}]} {
    %c0 = arith.constant 0 : index
    %c0_0 = arith.constant 0 : index
    %0 = vector.load %arg1[%c0, %c0_0] : memref<16x128xf32, #tpu.memory_space<vmem>>, vector<16x128xf32>
    %c0_1 = arith.constant 0 : index
    %c0_2 = arith.constant 0 : index
    %1 = vector.load %arg2[%c0_1, %c0_2] : memref<16x1xi32, #tpu.memory_space<vmem>>, vector<16x1xi32>
    %c0_3 = arith.constant 0 : index
    %c0_4 = arith.constant 0 : index
    %2 = vector.load %arg3[%c0_3, %c0_4] : memref<1x128xf32, #tpu.memory_space<vmem>>, vector<1x128xf32>
    %3 = tpu.iota {dimensions = array<i32: 1>} : vector<16x128xi32>
    %4 = vector.broadcast %1 : vector<16x1xi32> to vector<16x128xi32>
    %5 = arith.cmpi eq, %3, %4 : vector<16x128xi32>
    %cst = arith.constant 0.000000e+00 : f32
    %6 = vector.shape_cast %2 : vector<1x128xf32> to vector<1x128xf32>
    %7 = vector.broadcast %6 : vector<1x128xf32> to vector<16x128xf32>
    %8 = vector.broadcast %cst : f32 to vector<16x128xf32>
    %9 = arith.select %5, %7, %8 : vector<16x128xi1>, vector<16x128xf32>
    %cst_5 = arith.constant dense<0.000000e+00> : vector<16xf32>
    %10 = vector.multi_reduction <add>, %9, %cst_5 [1] : vector<16x128xf32> to vector<16xf32>
    %11 = vector.shape_cast %10 : vector<16xf32> to vector<16x1xf32>
    %12 = vector.broadcast %11 : vector<16x1xf32> to vector<16x128xf32>
    %13 = arith.subf %0, %12 : vector<16x128xf32>
    %14 = arith.select %5, %13, %0 : vector<16x128xi1>, vector<16x128xf32>
    %cst_6 = arith.constant 3.000000e+01 : f32
    %15 = vector.broadcast %cst_6 : f32 to vector<16x128xf32>
    %16 = arith.mulf %15, %14 : vector<16x128xf32>
    %cst_7 = arith.constant dense<0xFF800000> : vector<16xf32>
    %17 = vector.multi_reduction <maximumf>, %16, %cst_7 [1] : vector<16x128xf32> to vector<16xf32>
    %18 = vector.shape_cast %17 : vector<16xf32> to vector<16x1xf32>
    %19 = vector.broadcast %18 : vector<16x1xf32> to vector<16x128xf32>
    %20 = arith.subf %16, %19 : vector<16x128xf32>
    %21 = math.exp %20 : vector<16x128xf32>
    %cst_8 = arith.constant dense<0.000000e+00> : vector<16xf32>
    %22 = vector.multi_reduction <add>, %21, %cst_8 [1] : vector<16x128xf32> to vector<16xf32>
    %23 = vector.shape_cast %22 : vector<16xf32> to vector<16x1xf32>
    %24 = math.log %23 : vector<16x1xf32>
    %25 = arith.addf %18, %24 : vector<16x1xf32>
    %cst_9 = arith.constant 0.000000e+00 : f32
    %26 = vector.broadcast %cst_9 : f32 to vector<16x128xf32>
    %27 = arith.select %5, %16, %26 : vector<16x128xi1>, vector<16x128xf32>
    %cst_10 = arith.constant dense<0.000000e+00> : vector<16xf32>
    %28 = vector.multi_reduction <add>, %27, %cst_10 [1] : vector<16x128xf32> to vector<16xf32>
    %29 = vector.shape_cast %28 : vector<16xf32> to vector<16x1xf32>
    %30 = arith.subf %25, %29 : vector<16x1xf32>
    %31 = tpu.iota {dimensions = array<i32: 0>} : vector<16x1xi32>
    %c16_i32 = arith.constant 16 : i32
    %32 = arith.muli %arg0, %c16_i32 : i32
    %33 = vector.broadcast %32 : i32 to vector<16x1xi32>
    %34 = arith.addi %33, %31 : vector<16x1xi32>
    %c10_i32 = arith.constant 10 : i32
    %35 = vector.broadcast %c10_i32 : i32 to vector<16x1xi32>
    %36 = arith.cmpi slt, %34, %35 : vector<16x1xi32>
    %cst_11 = arith.constant 0.000000e+00 : f32
    %37 = vector.broadcast %cst_11 : f32 to vector<16x1xf32>
    %38 = arith.select %36, %30, %37 : vector<16x1xi1>, vector<16x1xf32>
    %39 = vector.shape_cast %38 : vector<16x1xf32> to vector<1x16x1xf32>
    %cst_12 = arith.constant dense<0.000000e+00> : vector<1xf32>
    %40 = vector.multi_reduction <add>, %39, %cst_12 [1, 2] : vector<1x16x1xf32> to vector<1xf32>
    %41 = vector.shape_cast %40 : vector<1xf32> to vector<1x1x1xf32>
    %42 = vector.extract %41[0, 0, 0] : f32 from vector<1x1x1xf32>
    %43 = tpu.iota {dimensions = array<i32: 1>} : vector<1x8x128xi32>
    %44 = tpu.iota {dimensions = array<i32: 2>} : vector<1x8x128xi32>
    %c0_i32 = arith.constant 0 : i32
    %45 = vector.broadcast %c0_i32 : i32 to vector<1x8x128xi32>
    %46 = arith.cmpi eq, %43, %45 : vector<1x8x128xi32>
    %c0_i32_13 = arith.constant 0 : i32
    %47 = vector.broadcast %c0_i32_13 : i32 to vector<1x8x128xi32>
    %48 = arith.cmpi eq, %44, %47 : vector<1x8x128xi32>
    %49 = arith.andi %46, %48 : vector<1x8x128xi1>
    %cst_14 = arith.constant 0.000000e+00 : f32
    %50 = vector.broadcast %42 : f32 to vector<1x8x128xf32>
    %51 = vector.broadcast %cst_14 : f32 to vector<1x8x128xf32>
    %52 = arith.select %49, %50, %51 : vector<1x8x128xi1>, vector<1x8x128xf32>
    %c0_15 = arith.constant 0 : index
    %c0_16 = arith.constant 0 : index
    %c0_17 = arith.constant 0 : index
    %53 = vector.load %arg4[%c0_15, %c0_16, %c0_17] : memref<1x8x128xf32, #tpu.memory_space<vmem>>, vector<1x8x128xf32>
    tpu.vector_store %arg4[%c0_15, %c0_16, %c0_17], %52 {strides = array<i32>} : memref<1x8x128xf32, #tpu.memory_space<vmem>>, vector<1x8x128xf32>,
    return
  }
  func.func @transform_0(%arg0: i32) -> (i32, i32) {
    %c0_i32 = arith.constant 0 : i32
    %c0_i32_0 = arith.constant 0 : i32
    return %arg0, %c0_i32 : i32, i32
  }
  func.func @transform_1(%arg0: i32) -> (i32, i32) {
    %c0_i32 = arith.constant 0 : i32
    %c0_i32_0 = arith.constant 0 : i32
    return %arg0, %c0_i32 : i32, i32
  }
  func.func @transform_2(%arg0: i32) -> (i32, i32) {
    %c0_i32 = arith.constant 0 : i32
    %c0_i32_0 = arith.constant 0 : i32
    %c0_i32_1 = arith.constant 0 : i32
    return %c0_i32, %c0_i32_0 : i32, i32
  }
  func.func @transform_3(%arg0: i32) -> (i32, i32, i32) {
    %c0_i32 = arith.constant 0 : i32
    %c0_i32_0 = arith.constant 0 : i32
    %c0_i32_1 = arith.constant 0 : i32
    return %arg0, %c0_i32, %c0_i32_0 : i32, i32, i32
  }
}

</mosaic_0001>

<bundles_post_ra>
// kernel: tpu_custom_call.1
= control target key start
LH: loop header
LB: loop body
LE: loop exit
PB: predicated region body
PF: predicated region fallthrough
CT: control target
= control target key end

     0   :  { %s224_s0 = inlined_call_operand.vmem [shape: f32[16,128], index: 0, kind: input, shape index: {}]   ;;  %s225_s1 = inlined_call_operand.vmem [shape: s32[16,1], index: 1, kind: input, shape index: {}]   ;;  %s226_s2 = inlined_call_operand.vmem [shape: f32[1,128], index: 2, kind: input, shape index: {}]   ;;  %s227_s3 = inlined_call_operand.hbm [shape: f32[1,8,128], index: 3, kind: output, shape index: {}]  }
   0x1   :  { %v18_v0 = vld [vmem:[%s225_s1 + $0x8] sm:$0xff] }
   0x2   :  { %8 = vsyncpa [#allocation3], 0  ;;  %v158_v1 = vmov 0   ;;  %v17_v2 = vld [vmem:[%s225_s1] sm:$0xff]  ;;  %v20_v3 = vlaneseq  ;;  %v16_v10 = vld [vmem:[%s224_s0 + $0x8] sm:$0xff]  ;;  %vm87_vm3 = vcmask 7168  }
   0x3   :  { %125 = vset.pattern.permute.xlu0 %v158_v1  ;;  %v120_v5 = vld [vmem:[%s226_s2] ss:$0 sm:$0xff] }
   0x4   :  { %26 = vperm.xlu0 %125, %v18_v0   ;;  %v186_v4 = vand.u32 127, %v20_v3  ;;  %v15_v13 = vld [vmem:[%s224_s0] sm:$0xff]  ;;  %v77_v32 = vshrl.u32 %v20_v3, 7  ;;  %s159_s0 = smov [#allocation2]  }
   0x5   :  { %s112_s20 = sshll.u32 %s159_s0, 4  ;;  %s113_s20 = int_to_ptr.vmem [resolvable:$true] %s112_s20 }
   0x6   :  { %v78_v35 = vadd.s32 8, %v77_v32  ;;  %vm100_vm4 = vcmp.eq.s32.totalorder %v77_v32, 0  ;;  %vm101_vm5 = vcmp.eq.s32.totalorder %v186_v4, 0  ;;  %s134_s22 = scalar_lea.vmem %s113_s20, 128  ;;  %p139_p1 = scmp.lt.s32.totalorder %s113_s20, %s113_s20 }
   0x7   :  { %vm102_vm6 = vmand %vm100_vm4, %vm101_vm5  ;;  %p135_p0 = scmp.ne.s32.totalorder %s113_s20, %s134_s22  ;;  %p140_p2 = scmp.lt.s32.totalorder %s134_s22, %s134_s22 }
   0x8   :  { %23 = vperm.xlu0 %125, %v17_v2   ;;  %vm84_vm2 = vcmp.lt.s32.totalorder %v78_v35, 10 }
   0x9   :  { %p141_p3 = por %p140_p2, %p139_p1 }
   0xb   :  { %p142_p4 = pnand %p141_p3, %p135_p0 }
  0x83   :  { %v27_v6 = vpop.permute.xlu0 %26 }
  0x84   :  { %vm29_vm0 = vcmp.eq.s32.totalorder %v186_v4, %v27_v6 }
  0x85   :  { %v37_v7 = vsel %vm29_vm0, %v120_v5, 0.0 }
  0x86   :  { %40 = vadd.xlane.f32.xlu1 %v37_v7 }
  0x87   :  { %v24_v8 = vpop.permute.xlu0 %23 }
  0x88   :  { %vm28_vm1 = vcmp.eq.s32.totalorder %v186_v4, %v24_v8 }
  0x89   :  { %v36_v9 = vsel %vm28_vm1, %v120_v5, 0.0 }
  0x8a   :  { %38 = vadd.xlane.f32.xlu1 %v36_v9 }
 0x113   :  { %v41_v11 = vpop.xlane.xlu1 %40 }
 0x114   :  { %v43_v12 = vsub.f32 %v16_v10, %v41_v11 }
 0x116   :  { %v45_v14 = vsel %vm29_vm0, %v43_v12, %v16_v10 }
 0x117   :  { %v39_v15 = vpop.xlane.xlu1 %38  ;;  %v47_v16 = vmul.f32 30.0, %v45_v14 }
 0x118   :  { %v42_v17 = vsub.f32 %v15_v13, %v39_v15 }
 0x119   :  { %50 = vmax.xlane.f32.xlu0 %v47_v16  ;;  %v69_v28 = vsel %vm29_vm0, %v47_v16, 0.0 }
 0x11a   :  { %v44_v18 = vsel %vm28_vm1, %v42_v17, %v15_v13 }
 0x11b   :  { %v46_v19 = vmul.f32 30.0, %v44_v18 }
 0x11d   :  { %48 = vmax.xlane.f32.xlu1 %v46_v19  ;;  %v68_v29 = vsel %vm28_vm1, %v46_v19, 0.0 }
 0x1a6   :  { %v51_v20 = vpop.xlane.xlu0 %50 }
 0x1a7   :  { %v53_v21 = vsub.f32 %v47_v16, %v51_v20 }
 0x1a9   :  { %v56_v22 = vmul.f32 1.442695, %v53_v21 }
 0x1aa   :  { %v49_v23 = vpop.xlane.xlu1 %48 }
 0x1ab   :  { %126 = vpow2.f32 %v56_v22  ;;  %v52_v24 = vsub.f32 %v46_v19, %v49_v23 }
 0x1ad   :  { %v54_v25 = vmul.f32 1.442695, %v52_v24 }
 0x1af   :  { %128 = vpow2.f32 %v54_v25 }
 0x1b5   :  { %v127_v26 = vpop.eup %126 }
 0x1b6   :  { %60 = vadd.xlane.f32.xlu1 %v127_v26 }
 0x1b9   :  { %v129_v27 = vpop.eup %128 }
 0x1ba   :  { %58 = vadd.xlane.f32.xlu1 %v129_v27 }
 0x1be   :  { %72 = vadd.xlane.f32.xlu1 %v69_v28 }
 0x1c2   :  { %70 = vadd.xlane.f32.xlu1 %v68_v29 }
 0x243   :  { %v61_v30 = vpop.xlane.xlu1 %60 }
 0x244   :  { %130 = vlog2.f32 %v61_v30 }
 0x247   :  { %v59_v31 = vpop.xlane.xlu1 %58 }
 0x248   :  { %132 = vlog2.f32 %v59_v31 }
 0x24b   :  { %v73_v36 = vpop.xlane.xlu1 %72 }
 0x24e   :  { %v131_v33 = vpop.eup %130 }
 0x24f   :  { %v65_v34 = vmul.f32 0.6931472, %v131_v33  ;;  %v71_v43 = vpop.xlane.xlu1 %70 }
 0x251   :  { %v67_v37 = vadd.f32 %v65_v34, %v51_v20 }
 0x252   :  { %v133_v38 = vpop.eup %132 }
 0x253   :  { %v63_v39 = vmul.f32 0.6931472, %v133_v38  ;;  %v75_v40 = vsub.f32 %v67_v37, %v73_v36 }
 0x255   :  { %v66_v41 = vadd.f32 %v63_v39, %v49_v23  ;;  %v86_v42 = vsel %vm84_vm2, %v75_v40, 0.0 }
 0x256   :  { %v89_v46 = vsel %vm87_vm3, %v86_v42, 0.0 }
 0x257   :  { %v74_v44 = vsub.f32 %v66_v41, %v71_v43 }
 0x259   :  { %v88_v45 = vsel %vm87_vm3, %v74_v44, 0.0 }
 0x25a   :  { %v90_v47 = vadd.f32 %v89_v46, %v88_v45 }
 0x25c   :  { %91 = vadd.xlane.f32.xlu1 %v90_v47 }
 0x2e9   :  { %v92_v48 = vpop.xlane.xlu1 %91 }
 0x2ea   :  { %v93_v49 = vrot.slane %v92_v48, 4 }
 0x2ec   :  { %v94_v50 = vadd.f32 %v93_v49, %v92_v48 }
 0x2ee   :  { %v95_v51 = vrot.slane %v94_v50, 2 }
 0x2f0   :  { %v96_v52 = vadd.f32 %v95_v51, %v94_v50 }
 0x2f2   :  { %v97_v53 = vrot.slane %v96_v52, 1 }
 0x2f4   :  { %v98_v54 = vadd.f32 %v97_v53, %v96_v52 }
 0x2f6   :  { %121 = vpush %v98_v54 }
 0x327   :  { %s122_s21 = spop %121 }
 0x328   :  { %v103_v55 = vstv %s122_s21 }
 0x329   :  { %v104_v56 = vsel %vm102_vm6, %v103_v55, 0.0 }
 0x32a   :  { %105 = vst [vmem:[#allocation2] sm:$0xff] %v104_v56 }
 0x32b   :  { %145 = shalt.err (!%p142_p4)
}
 0x32c   :  { %s146_s25 = scalar_lea.hbm %s227_s3, 128 }
 0x32d   :  { %p147_p5 = scmp.ne.s32.totalorder %s227_s3, %s146_s25  ;;  %p150_p6 = scmp.lt.u32.totalorder %s146_s25, %s227_s3 }
 0x32f   :  { %p152_p7 = pnand %p150_p6, %p147_p5 }
 0x331   :  { %155 = shalt.err (!%p152_p7)
}
 0x332   :  { %115 = dma.vmem_to_hbm [thread:$0]  %s113_s20, 128, %s227_s3, [#allocation3]  }
 0x333   :  { %156 = dma.done.wait [#allocation3], 128  }
 0x334   :  { %157 = vsyncadd [#allocation3], 4294967168 }
 0x335   :  { %119 = vsyncpa [#allocation3], 1 }

</bundles_post_ra>
